<compile_context>
chip_gen: v6e
topology: v6e:2x2x1
jax: 0.10.0
libtpu: 0.0.40
codegen_flags: <defaults>
</compile_context>

<pallas_src>
import functools
import math

import jax
import jax.numpy as jnp
from jax import lax
from jax.experimental import pallas as pl
from jax.experimental.pallas import tpu as pltpu


def _patch_embed_ln_kernel(x_ref, w_ref, p_ref, o_ref, *, eps, compute_dtype):
    """Fused patch-embedding (stride==kernel conv as matmul) + LayerNorm.

    x_ref: [tR, ph, Gw, pw*C]  tile of image patch-rows (NHWC-derived layout)
    w_ref: [ph, pw*C, D]       projection weight, resident across grid steps
    p_ref: [3, D]              row 0 = conv bias, row 1 = LN gamma, row 2 = LN beta
    o_ref: [tR*Gw, D]
    """
    tR, ph, Gw, pwC = x_ref.shape
    D = w_ref.shape[-1]
    rows = tR * Gw

    # Accumulate the conv as ph small matmuls (static unroll; ph is 4 in Swin).
    acc = jnp.zeros((rows, D), jnp.float32)
    for i in range(ph):
        # (tR, Gw, pw*C) -> (tR*Gw, pw*C): merges a leading dim into the
        # sublane dim; layout-preserving when Gw % 8 == 0 (true for real Swin).
        xi = x_ref[:, i].reshape(rows, pwC).astype(compute_dtype)
        wi = w_ref[i].astype(compute_dtype)
        acc = acc + jnp.dot(xi, wi, preferred_element_type=jnp.float32)

    y = acc + p_ref[0:1, :]                                    # conv bias
    # One-pass LayerNorm statistics (no centered temporary).
    mean = jnp.mean(y, axis=-1, keepdims=True)
    msq = jnp.mean(y * y, axis=-1, keepdims=True)
    var = jnp.maximum(msq - mean * mean, 0.0)
    inv = lax.rsqrt(var + eps)
    o_ref[...] = ((y - mean) * inv * p_ref[1:2, :] + p_ref[2:3, :]).astype(o_ref.dtype)


def _to_patch_row_blocks(pixel_values, patch_size, input_format):
    """Pad to patch multiples and (freely) reshape to (B*Gh, ph, Gw, pw*C)."""
    ph, pw = patch_size
    if input_format == "NCHW":
        # One transpose copy; pass NHWC input to skip it entirely.
        pixel_values = jnp.transpose(pixel_values, (0, 2, 3, 1))
    elif input_format != "NHWC":
        raise ValueError(f"unknown input_format {input_format!r}")

    B, H, W, C = pixel_values.shape
    pad_h, pad_w = (-H) % ph, (-W) % pw
    if pad_h or pad_w:  # maybe_pad: zero-pad bottom/right
        pixel_values = jnp.pad(
            pixel_values, ((0, 0), (0, pad_h), (0, pad_w), (0, 0)))
        H, W = H + pad_h, W + pad_w
    Gh, Gw = H // ph, W // pw
    # Row-major nesting b, gh, i, gw, (j, c) is preserved -> free reshape,
    # no data movement, no HBM round trip.
    x = pixel_values.reshape(B * Gh, ph, Gw, pw * C)
    return x, B, Gh, Gw, C


def _pick_row_tile(R, Gw, rows_per_tile):
    """Pick tR (image patch-rows per grid step).

      * (tR*Gw) % 8 == 0 so the output block is sublane-aligned (unless the
        block spans the full row extent, which is always legal).
      * >= 2 grid steps when R >= 2 (keeps both v7x TensorCores busy).
      * prefer tR | R so no grid step sees a garbage-padded partial tile
        (avoids NaNs in the LayerNorm of masked-out rows).
    """
    m = 8 // math.gcd(Gw, 8)
    tR = max(1, rows_per_tile // max(Gw, 1))
    if R >= 2:
        tR = min(tR, (R + 1) // 2)
    tR = min(tR, R)
    tR_aligned = (tR // m) * m
    if tR_aligned < 1:
        return R                              # tiny problem: one full block
    for cand in range(tR_aligned, 0, -m):     # prefer an exact divisor of R
        if R % cand == 0:
            return cand
    return tR_aligned


def swin_embeddings_forward(pixel_values, params, *, patch_size, eps=1e-5,
                            input_format="NCHW", compute_dtype=jnp.bfloat16,
                            out_dtype=None, rows_per_tile=2048,
                            vmem_limit_bytes=None):
    """Forward pass of SwinEmbeddings (patch conv + LayerNorm).

    pixel_values: (B, C, H, W) (or (B, H, W, C) with input_format="NHWC").
    Returns (embeddings (B, seq_len, D), (Hp, Wp)).
    """
    ph, pw = patch_size
    x, B, Gh, Gw, C = _to_patch_row_blocks(pixel_values, patch_size, input_format)
    R = B * Gh
    N = R * Gw
    pwC = pw * C

    proj_w = params["proj_w"]                  # (D, C, ph, pw), torch layout
    D = proj_w.shape[0]
    # (D, C, ph, pw) -> (ph, pw, C, D) -> (ph, pw*C, D): matches the (j, c)
    # contiguity of an NHWC image row, so no pixel shuffling in the kernel.
    w = jnp.transpose(proj_w, (2, 3, 1, 0)).reshape(ph, pwC, D).astype(compute_dtype)
    pgb = jnp.stack([params["proj_b"], params["ln_gamma"], params["ln_beta"]],
                    axis=0).astype(jnp.float32)

    if out_dtype is None:
        out_dtype = pixel_values.dtype

    tR = _pick_row_tile(R, Gw, rows_per_tile)
    grid = (pl.cdiv(R, tR),)

    flops = 2 * N * (ph * pwC) * D
    bytes_accessed = (x.size * x.dtype.itemsize + w.size * w.dtype.itemsize
                      + pgb.size * pgb.dtype.itemsize
                      + N * D * jnp.dtype(out_dtype).itemsize)

    compiler_kwargs = dict(dimension_semantics=("parallel",))   # megacore on v7x
    if vmem_limit_bytes is not None:
        compiler_kwargs["vmem_limit_bytes"] = vmem_limit_bytes

    out = pl.pallas_call(
        functools.partial(_patch_embed_ln_kernel, eps=eps,
                          compute_dtype=compute_dtype),
        out_shape=jax.ShapeDtypeStruct((N, D), out_dtype),
        grid_spec=pltpu.PrefetchScalarGridSpec(
            num_scalar_prefetch=0,
            grid=grid,
            in_specs=[
                # Contiguous slab of tR image patch-rows; trailing dims full.
                pl.BlockSpec((tR, ph, Gw, pwC), lambda r: (r, 0, 0, 0)),
                # Projection weight, resident across all grid steps.
                pl.BlockSpec((ph, pwC, D), lambda r: (0, 0, 0)),
                # bias / gamma / beta packed, resident.
                pl.BlockSpec((3, D), lambda r: (0, 0)),
            ],
            out_specs=pl.BlockSpec((tR * Gw, D), lambda r: (r, 0)),
        ),
        compiler_params=pltpu.CompilerParams(**compiler_kwargs),
        cost_estimate=pl.CostEstimate(flops=flops, transcendentals=0,
                                      bytes_accessed=bytes_accessed),
    )(x, w, pgb)

    embeddings = out.reshape(B, Gh * Gw, D)
    return embeddings, (Gh, Gw)


def _reference(pixel_values, params, *, patch_size, eps=1e-5):
    """Pure-JAX f32 reference mirroring the PyTorch module (incl. maybe_pad)."""
    ph, pw = patch_size
    B, C, H, W = pixel_values.shape
    pad_h, pad_w = (-H) % ph, (-W) % pw
    if pad_h or pad_w:
        pixel_values = jnp.pad(
            pixel_values, ((0, 0), (0, 0), (0, pad_h), (0, pad_w)))
    y = lax.conv_general_dilated(
        pixel_values, params["proj_w"],
        window_strides=(ph, pw), padding="VALID",
        dimension_numbers=("NCHW", "OIHW", "NCHW"))
    y = y + params["proj_b"][None, :, None, None]
    B, D, Hp, Wp = y.shape
    y = y.reshape(B, D, Hp * Wp).transpose(0, 2, 1)            # (B, seq, D)
    mean = jnp.mean(y, axis=-1, keepdims=True)
    var = jnp.mean((y - mean) ** 2, axis=-1, keepdims=True)
    yn = (y - mean) / jnp.sqrt(var + eps)
    yn = yn * params["ln_gamma"] + params["ln_beta"]
    return yn, (Hp, Wp)


if __name__ == "__main__":
    # --- Case 1: small Swin-like config: image 32x32, patch 4, 4 channels,
    #     embed_dim 32.  (Gw = 8 keeps the in-kernel merge reshape layout-free.)
    batch, num_channels, image_size = 2, 4, 32
    patch = (4, 4)
    embed_dim = 32

    key = jax.random.PRNGKey(0)
    k_x, k_w, k_b = jax.random.split(key, 3)
    pixel_values = jax.random.normal(
        k_x, (batch, num_channels, image_size, image_size), dtype=jnp.float32)
    params = {
        "proj_w": 0.02 * jax.random.normal(
            k_w, (embed_dim, num_channels, patch[0], patch[1]),
            dtype=jnp.float32),
        "proj_b": 0.01 * jax.random.normal(k_b, (embed_dim,), dtype=jnp.float32),
        "ln_gamma": jnp.ones((embed_dim,), dtype=jnp.float32),
        "ln_beta": jnp.zeros((embed_dim,), dtype=jnp.float32),
    }

    ref, ref_dims = _reference(pixel_values, params, patch_size=patch)

    # (a) exact-semantics check: f32 compute vs the f32 reference.
    emb32, dims32 = swin_embeddings_forward(
        pixel_values, params, patch_size=patch, compute_dtype=jnp.float32)
    emb32 = jax.block_until_ready(emb32)
    assert dims32 == ref_dims, (dims32, ref_dims)
    assert emb32.shape == (batch, (image_size // patch[0]) ** 2, embed_dim)
    assert jnp.allclose(emb32, ref, atol=1e-4, rtol=1e-4), float(
        jnp.max(jnp.abs(emb32 - ref)))

    # (b) default fast path: bf16 MXU compute (LayerNorm still f32).
    emb_bf, dims_bf = swin_embeddings_forward(pixel_values, params,
                                              patch_size=patch)
    emb_bf = jax.block_until_ready(emb_bf)
    assert dims_bf == ref_dims
    assert jnp.allclose(emb_bf, ref, atol=6e-2), float(
        jnp.max(jnp.abs(emb_bf - ref)))

    # (c) NHWC input: zero-extra-copy path (weight is permuted, not pixels).
    emb_nhwc, dims_nhwc = swin_embeddings_forward(
        pixel_values.transpose(0, 2, 3, 1), params, patch_size=patch,
        input_format="NHWC", compute_dtype=jnp.float32)
    emb_nhwc = jax.block_until_ready(emb_nhwc)
    assert dims_nhwc == ref_dims
    assert jnp.allclose(emb_nhwc, ref, atol=1e-4, rtol=1e-4), float(
        jnp.max(jnp.abs(emb_nhwc - ref)))

    # --- Case 2: Swin-T-like per-patch sizes (C=3 -> pw*C=12, D=96), image 64,
    #     multi-step grid (R=64 -> 2 steps of tR=32), bf16 compute.
    b2, c2, hw2, d2 = 4, 3, 64, 96
    k1, k2, k3, k4, k5 = jax.random.split(jax.random.PRNGKey(1), 5)
    px2 = jax.random.normal(k1, (b2, c2, hw2, hw2), dtype=jnp.float32)
    params2 = {
        "proj_w": 0.02 * jax.random.normal(k2, (d2, c2, 4, 4),
                                           dtype=jnp.float32),
        "proj_b": 0.01 * jax.random.normal(k3, (d2,), dtype=jnp.float32),
        "ln_gamma": 1.0 + 0.1 * jax.random.normal(k4, (d2,), dtype=jnp.float32),
        "ln_beta": 0.1 * jax.random.normal(k5, (d2,), dtype=jnp.float32),
    }
    emb2, dims2 = swin_embeddings_forward(px2, params2, patch_size=(4, 4),
                                          rows_per_tile=512)
    emb2 = jax.block_until_ready(emb2)
    ref2, rdims2 = _reference(px2, params2, patch_size=(4, 4))
    assert dims2 == rdims2, (dims2, rdims2)
    assert emb2.shape == (b2, (hw2 // 4) ** 2, d2)
    assert jnp.allclose(emb2, ref2, atol=6e-2), float(
        jnp.max(jnp.abs(emb2 - ref2)))

    print("KERNEL_OK")
</pallas_src>

<mosaic_0001>
module attributes {stable_mosaic.version = 11 : i64} {
  func.func @_patch_embed_ln_kernel(%arg0: i32, %arg1: memref<8x4x8x16xf32, #tpu.memory_space<vmem>>, %arg2: memref<4x16x32xf32, #tpu.memory_space<vmem>>, %arg3: memref<3x32xf32, #tpu.memory_space<vmem>>, %arg4: memref<64x32xf32, #tpu.memory_space<vmem>>) attributes {dimension_semantics = [#tpu.dimension_semantics<parallel>], iteration_bounds = array<i64: 2>, scalar_prefetch = 0 : i64, scratch_operands = 0 : i64, tpu.core_type = #tpu.core_type<tc>, window_params = [{transform_indices = @transform_0, window_bounds = array<i64: 8, 4, 8, 16>}, {pipeline_mode = #tpu.pipeline_mode<synchronous>, transform_indices = @transform_1, window_bounds = array<i64: 4, 16, 32>}, {pipeline_mode = #tpu.pipeline_mode<synchronous>, transform_indices = @transform_2, window_bounds = array<i64: 3, 32>}, {transform_indices = @transform_3, window_bounds = array<i64: 64, 32>}]} {
    %cst = arith.constant 0.000000e+00 : f32
    %0 = vector.broadcast %cst : f32 to vector<64x32xf32>
    %c0 = arith.constant 0 : index
    %c0_0 = arith.constant 0 : index
    %c0_1 = arith.constant 0 : index
    %c0_2 = arith.constant 0 : index
    %1 = vector.load %arg1[%c0, %c0_0, %c0_1, %c0_2] : memref<8x4x8x16xf32, #tpu.memory_space<vmem>>, vector<8x1x8x16xf32>
    %2 = vector.shape_cast %1 : vector<8x1x8x16xf32> to vector<8x8x16xf32>
    %3 = vector.shape_cast %2 : vector<8x8x16xf32> to vector<64x16xf32>
    %c0_3 = arith.constant 0 : index
    %c0_4 = arith.constant 0 : index
    %c0_5 = arith.constant 0 : index
    %4 = vector.load %arg2[%c0_3, %c0_4, %c0_5] : memref<4x16x32xf32, #tpu.memory_space<vmem>>, vector<1x16x32xf32>
    %5 = vector.shape_cast %4 : vector<1x16x32xf32> to vector<16x32xf32>
    %cst_6 = arith.constant dense<0.000000e+00> : vector<64x32xf32>
    %6 = tpu.matmul %3, %5, %cst_6 {dimension_numbers = #tpu.dot_dimension_numbers<[1], [0], [0], [1], [0, 0, 1, 1], [], []>} : vector<64x16xf32>, vector<16x32xf32>, vector<64x32xf32> -> vector<64x32xf32>
    %7 = arith.addf %0, %6 : vector<64x32xf32>
    %c0_7 = arith.constant 0 : index
    %c1 = arith.constant 1 : index
    %c0_8 = arith.constant 0 : index
    %c0_9 = arith.constant 0 : index
    %8 = vector.load %arg1[%c0_7, %c1, %c0_8, %c0_9] : memref<8x4x8x16xf32, #tpu.memory_space<vmem>>, vector<8x1x8x16xf32>
    %9 = vector.shape_cast %8 : vector<8x1x8x16xf32> to vector<8x8x16xf32>
    %10 = vector.shape_cast %9 : vector<8x8x16xf32> to vector<64x16xf32>
    %c1_10 = arith.constant 1 : index
    %c0_11 = arith.constant 0 : index
    %c0_12 = arith.constant 0 : index
    %11 = vector.load %arg2[%c1_10, %c0_11, %c0_12] : memref<4x16x32xf32, #tpu.memory_space<vmem>>, vector<1x16x32xf32>
    %12 = vector.shape_cast %11 : vector<1x16x32xf32> to vector<16x32xf32>
    %cst_13 = arith.constant dense<0.000000e+00> : vector<64x32xf32>
    %13 = tpu.matmul %10, %12, %cst_13 {dimension_numbers = #tpu.dot_dimension_numbers<[1], [0], [0], [1], [0, 0, 1, 1], [], []>} : vector<64x16xf32>, vector<16x32xf32>, vector<64x32xf32> -> vector<64x32xf32>
    %14 = arith.addf %7, %13 : vector<64x32xf32>
    %c0_14 = arith.constant 0 : index
    %c2 = arith.constant 2 : index
    %c0_15 = arith.constant 0 : index
    %c0_16 = arith.constant 0 : index
    %15 = vector.load %arg1[%c0_14, %c2, %c0_15, %c0_16] : memref<8x4x8x16xf32, #tpu.memory_space<vmem>>, vector<8x1x8x16xf32>
    %16 = vector.shape_cast %15 : vector<8x1x8x16xf32> to vector<8x8x16xf32>
    %17 = vector.shape_cast %16 : vector<8x8x16xf32> to vector<64x16xf32>
    %c2_17 = arith.constant 2 : index
    %c0_18 = arith.constant 0 : index
    %c0_19 = arith.constant 0 : index
    %18 = vector.load %arg2[%c2_17, %c0_18, %c0_19] : memref<4x16x32xf32, #tpu.memory_space<vmem>>, vector<1x16x32xf32>
    %19 = vector.shape_cast %18 : vector<1x16x32xf32> to vector<16x32xf32>
    %cst_20 = arith.constant dense<0.000000e+00> : vector<64x32xf32>
    %20 = tpu.matmul %17, %19, %cst_20 {dimension_numbers = #tpu.dot_dimension_numbers<[1], [0], [0], [1], [0, 0, 1, 1], [], []>} : vector<64x16xf32>, vector<16x32xf32>, vector<64x32xf32> -> vector<64x32xf32>
    %21 = arith.addf %14, %20 : vector<64x32xf32>
    %c0_21 = arith.constant 0 : index
    %c3 = arith.constant 3 : index
    %c0_22 = arith.constant 0 : index
    %c0_23 = arith.constant 0 : index
    %22 = vector.load %arg1[%c0_21, %c3, %c0_22, %c0_23] : memref<8x4x8x16xf32, #tpu.memory_space<vmem>>, vector<8x1x8x16xf32>
    %23 = vector.shape_cast %22 : vector<8x1x8x16xf32> to vector<8x8x16xf32>
    %24 = vector.shape_cast %23 : vector<8x8x16xf32> to vector<64x16xf32>
    %c3_24 = arith.constant 3 : index
    %c0_25 = arith.constant 0 : index
    %c0_26 = arith.constant 0 : index
    %25 = vector.load %arg2[%c3_24, %c0_25, %c0_26] : memref<4x16x32xf32, #tpu.memory_space<vmem>>, vector<1x16x32xf32>
    %26 = vector.shape_cast %25 : vector<1x16x32xf32> to vector<16x32xf32>
    %cst_27 = arith.constant dense<0.000000e+00> : vector<64x32xf32>
    %27 = tpu.matmul %24, %26, %cst_27 {dimension_numbers = #tpu.dot_dimension_numbers<[1], [0], [0], [1], [0, 0, 1, 1], [], []>} : vector<64x16xf32>, vector<16x32xf32>, vector<64x32xf32> -> vector<64x32xf32>
    %28 = arith.addf %21, %27 : vector<64x32xf32>
    %c0_28 = arith.constant 0 : index
    %c0_29 = arith.constant 0 : index
    %29 = vector.load %arg3[%c0_28, %c0_29] : memref<3x32xf32, #tpu.memory_space<vmem>>, vector<1x32xf32>
    %30 = vector.broadcast %29 : vector<1x32xf32> to vector<64x32xf32>
    %31 = arith.addf %28, %30 : vector<64x32xf32>
    %cst_30 = arith.constant dense<0.000000e+00> : vector<64xf32>
    %32 = vector.multi_reduction <add>, %31, %cst_30 [1] : vector<64x32xf32> to vector<64xf32>
    %33 = vector.shape_cast %32 : vector<64xf32> to vector<64x1xf32>
    %cst_31 = arith.constant 3.200000e+01 : f32
    %34 = vector.broadcast %cst_31 : f32 to vector<64x1xf32>
    %35 = arith.divf %33, %34 : vector<64x1xf32>
    %36 = arith.mulf %31, %31 : vector<64x32xf32>
    %cst_32 = arith.constant dense<0.000000e+00> : vector<64xf32>
    %37 = vector.multi_reduction <add>, %36, %cst_32 [1] : vector<64x32xf32> to vector<64xf32>
    %38 = vector.shape_cast %37 : vector<64xf32> to vector<64x1xf32>
    %cst_33 = arith.constant 3.200000e+01 : f32
    %39 = vector.broadcast %cst_33 : f32 to vector<64x1xf32>
    %40 = arith.divf %38, %39 : vector<64x1xf32>
    %41 = arith.mulf %35, %35 : vector<64x1xf32>
    %42 = arith.subf %40, %41 : vector<64x1xf32>
    %cst_34 = arith.constant 0.000000e+00 : f32
    %43 = vector.broadcast %cst_34 : f32 to vector<64x1xf32>
    %44 = arith.maximumf %42, %43 : vector<64x1xf32>
    %cst_35 = arith.constant 9.99999974E-6 : f32
    %45 = vector.broadcast %cst_35 : f32 to vector<64x1xf32>
    %46 = arith.addf %44, %45 : vector<64x1xf32>
    %47 = math.rsqrt %46 : vector<64x1xf32>
    %48 = vector.broadcast %35 : vector<64x1xf32> to vector<64x32xf32>
    %49 = arith.subf %31, %48 : vector<64x32xf32>
    %50 = vector.broadcast %47 : vector<64x1xf32> to vector<64x32xf32>
    %51 = arith.mulf %49, %50 : vector<64x32xf32>
    %c1_36 = arith.constant 1 : index
    %c0_37 = arith.constant 0 : index
    %52 = vector.load %arg3[%c1_36, %c0_37] : memref<3x32xf32, #tpu.memory_space<vmem>>, vector<1x32xf32>
    %53 = vector.broadcast %52 : vector<1x32xf32> to vector<64x32xf32>
    %54 = arith.mulf %51, %53 : vector<64x32xf32>
    %c2_38 = arith.constant 2 : index
    %c0_39 = arith.constant 0 : index
    %55 = vector.load %arg3[%c2_38, %c0_39] : memref<3x32xf32, #tpu.memory_space<vmem>>, vector<1x32xf32>
    %56 = vector.broadcast %55 : vector<1x32xf32> to vector<64x32xf32>
    %57 = arith.addf %54, %56 : vector<64x32xf32>
    %c0_40 = arith.constant 0 : index
    %c0_41 = arith.constant 0 : index
    %58 = vector.load %arg4[%c0_40, %c0_41] : memref<64x32xf32, #tpu.memory_space<vmem>>, vector<64x32xf32>
    tpu.vector_store %arg4[%c0_40, %c0_41], %57 {strides = array<i32>} : memref<64x32xf32, #tpu.memory_space<vmem>>, vector<64x32xf32>,
    return
  }
  func.func @transform_0(%arg0: i32) -> (i32, i32, i32, i32) {
    %c0_i32 = arith.constant 0 : i32
    %c0_i32_0 = arith.constant 0 : i32
    %c0_i32_1 = arith.constant 0 : i32
    %c0_i32_2 = arith.constant 0 : i32
    return %arg0, %c0_i32, %c0_i32_0, %c0_i32_1 : i32, i32, i32, i32
  }
  func.func @transform_1(%arg0: i32) -> (i32, i32, i32) {
    %c0_i32 = arith.constant 0 : i32
    %c0_i32_0 = arith.constant 0 : i32
    %c0_i32_1 = arith.constant 0 : i32
    %c0_i32_2 = arith.constant 0 : i32
    return %c0_i32, %c0_i32_0, %c0_i32_1 : i32, i32, i32
  }
  func.func @transform_2(%arg0: i32) -> (i32, i32) {
    %c0_i32 = arith.constant 0 : i32
    %c0_i32_0 = arith.constant 0 : i32
    %c0_i32_1 = arith.constant 0 : i32
    return %c0_i32, %c0_i32_0 : i32, i32
  }
  func.func @transform_3(%arg0: i32) -> (i32, i32) {
    %c0_i32 = arith.constant 0 : i32
    %c0_i32_0 = arith.constant 0 : i32
    return %arg0, %c0_i32 : i32, i32
  }
}

</mosaic_0001>

<bundles_post_ra>
// kernel: tpu_custom_call.1
= control target key start
LH: loop header
LB: loop body
LE: loop exit
PB: predicated region body
PF: predicated region fallthrough
CT: control target
= control target key end

     0   :  { %8 = vsyncpa [#allocation3], 0  ;;  %s1821_s0 = inlined_call_operand.hbm [shape: f32[16,4,8,16], index: 0, kind: input, shape index: {}]   ;;  %s1822_s1 = inlined_call_operand.hbm [shape: f32[4,16,32], index: 1, kind: input, shape index: {}]   ;;  %s1823_s2 = inlined_call_operand.hbm [shape: f32[3,32], index: 2, kind: input, shape index: {}]   ;;  %s1824_s3 = inlined_call_operand.vmem [shape: f32[128,32], index: 3, kind: output, shape index: {}]  }
   0x1   :  { %10 = vsyncpa [#allocation3 + $0x1], 0 }
   0x2   :  { %11 = vsyncpa [#allocation5], 0  ;;  %s1469_s12 = smov 0   ;;  %s1471_s13 = smov 0  }
   0x3   :  { %s1473_s14 = smov 0   ;;  %s1475_s15 = smov 0  }
   0x4 LB: > { %s1063_s16 = sadd.s32 4294967295, %s1442_s15   ;;  %p37_p0 = scmp.ne.s32.totalorder %s1434_s13, %s1430_s12  ;;  %s1442_s15 = sphi %s1475_s15, %s1840_s15   ;;  %s1438_s14 = sphi %s1473_s14, %s1839_s14   ;;  %s1434_s13 = sphi %s1471_s13, %s1838_s13   ;;  %s1430_s12 = sphi %s1469_s12, %s1837_s12  }
   0x5   : > { %p1491_p1 = scmp.eq.s32.totalorder %s1063_s16, 0  ;;  %p1065_p2 = scmp.ge.s32.totalorder %s1442_s15, 1 }
   0x6   : > { %p116_p3 = scmp.lt.s32.totalorder %s1442_s15, 3  ;;  %s1444_s20 = smov [#allocation4]  }
   0x7   : > { %s1829_s17 = scalar_select %p1491_p1, 1, 0 }
   0x8   : > { %p1499_p4 = por %p1491_p1, %p37_p0  ;;  %p1503_p5 = pnand %p1065_p2, %p116_p3 }
   0x9   : > { %s128_s21 = sshll.u32 %s1444_s20, 4  ;;  %s1445_s23 = smov [#allocation6]   ;;  %s129_s21 = int_to_ptr.vmem [resolvable:$true] %s128_s21 }
   0xa   : > { %s1830_s18 = scalar_select %p1499_p4, 1, 0 }
   0xb   : > { %s1831_s19 = scalar_select %p1503_p5, 1, 0 }
   0xc   : > { %p1256_p6 = pneg %p1503_p5  ;;  %s142_s24 = sshll.u32 %s1445_s23, 4  ;;  %s143_s24 = int_to_ptr.vmem [resolvable:$true] %s142_s24 }
   0xd   : > { %s1335_s25 = scalar_lea.vmem %s129_s21, 1024  ;;  %p1343_p12 = scmp.lt.s32.totalorder %s129_s21, %s129_s21 }
   0xe   : > { %p1511_p7 = pnand %p1256_p6, %p1491_p1  ;;  %p1336_p9 = scmp.ne.s32.totalorder %s129_s21, %s1335_s25 }
   0xf   : > { %p1344_p13 = scmp.lt.s32.totalorder %s1335_s25, %s1335_s25 }
  0x10   : > { %p1326_p8 = pneg %p1511_p7 }
  0x11   : > { %p1345_p0 = por %p1344_p13, %p1343_p12 }
  0x12   : > { %p1338_p10 = pnand %p1336_p9, %p1326_p8 }
  0x14   : > { %p1339_p11 = pneg %p1338_p10 }
  0x16   : > { %p1346_p2 = pnand %p1345_p0, %p1339_p11 }
  0x18   : > { %1349 = shalt.err (!%p1346_p2)
}
  0x19   : > { %s1446_s26 = smov 128   ;;  %s1447_s27 = smov 8  }
  0x1a   : > { %1259 = dma.hbm_to_vmem [thread:$0]  (!%p1511_p7), %s1822_s1, 1024, %s129_s21, [#allocation5], %s1446_s26, %s1446_s26, %s1447_s27  }
  0x1b   : > { %s1361_s30 = scalar_lea.vmem %s143_s24, 64  ;;  %p1369_p10 = scmp.lt.s32.totalorder %s143_s24, %s143_s24 }
  0x1c   : > { %p1362_p3 = scmp.ne.s32.totalorder %s143_s24, %s1361_s30  ;;  %p1370_p11 = scmp.lt.s32.totalorder %s1361_s30, %s1361_s30 }
  0x1e   : > { %p1364_p6 = pnand %p1362_p3, %p1326_p8  ;;  %p1371_p12 = por %p1370_p11, %p1369_p10 }
  0x20   : > { %p1365_p9 = pneg %p1364_p6 }
  0x22   : > { %p1372_p13 = pnand %p1371_p12, %p1365_p9 }
  0x24   : > { %1375 = shalt.err (!%p1372_p13)
}
  0x25   : > { %1262 = dma.hbm_to_vmem [thread:$0]  (!%p1511_p7), %s1823_s2, 64, %s143_s24, [#allocation5]  }
  0x26   : > { %s1537_s6 = sadd.s32 1, %s1442_s15   ;;  %s24_s7 = sadd.s32 1, %s1438_s14 }
  0x27   : > { %s21_s8 = ssub.s32 %s1442_s15, %s1537_s6  ;;  %p31_p8 = scmp.ne.s32.totalorder %s1438_s14, %s1434_s13 }
  0x28   : > { %p22_p0 = scmp.eq.s32.totalorder %s21_s8, 0  ;;  %p32_p2 = scmp.eq.s32.totalorder %s1442_s15, 0 }
  0x29   : > { %p1269_p3 = scmp.lt.s32.totalorder %s1442_s15, 2  ;;  %s153_s9 = sand.u32 1, %s1438_s14  }
  0x2a   : > { %s1548_s10 = scalar_select %p22_p0, %s1438_s14, %s24_s7  }
  0x2b   : > { %p33_p6 = por %p32_p2, %p31_p8  ;;  %s1069_s11 = sshll.u32 %s153_s9, 8 }
  0x2c   : > { %s1141_s12 = sshll.u32 %s1442_s15, 12  ;;  %s157_s23 = scalar_lea.vmem [#allocation2], %s1069_s11 }
  0x2d   : > { %s1554_s22 = scalar_lea.hbm %s1821_s0, %s1141_s12  ;;  %s165_s24 = sshll.u32 %s157_s23, 4  ;;  %s1560_s24 = int_to_ptr.vmem [resolvable:$true] %s165_s24 }
  0x2e   : > { %p1556_p7 = pnand %p1269_p3, %p33_p6  ;;  %s1562_s28 = scalar_lea.sflag [#allocation3], %s153_s9 }
  0x2f   : > { %s1376_s29 = scalar_lea.hbm %s1554_s22, 4096  ;;  %s1381_s5 = scalar_lea.hbm %s1821_s0, 8192 }
  0x30   : > { %p1377_p9 = scmp.ne.s32.totalorder %s1554_s22, %s1376_s29  ;;  %p1378_p10 = pneg %p1556_p7 }
  0x31   : > { %p1382_p13 = scmp.lt.s32.totalorder %s1554_s22, %s1821_s0  ;;  %p1383_p8 = scmp.lt.s32.totalorder %s1381_s5, %s1376_s29 }
  0x32   : > { %p1379_p11 = pnand %p1378_p10, %p1377_p9 }
  0x33   : > { %p1384_p0 = por %p1383_p8, %p1382_p13 }
  0x34   : > { %p1380_p12 = pneg %p1379_p11 }
  0x36   : > { %p1385_p2 = pnand %p1384_p0, %p1380_p12 }
  0x38   : > { %1388 = shalt.err (!%p1385_p2)
}
  0x39   : > { %s1389_s9 = scalar_lea.vmem %s1560_s24, 4096  ;;  %s1448_s11 = smov [#allocation2]  }
  0x3a   : > { %p1390_p3 = scmp.ne.s32.totalorder %s1560_s24, %s1389_s9  ;;  %s1394_s12 = sshll.u32 %s1448_s11, 4  ;;  %s1395_s12 = int_to_ptr.vmem [resolvable:$false] %s1394_s12 }
  0x3b   : > { %s1396_s20 = scalar_lea.vmem %s1395_s12, 8192  ;;  %p1397_p11 = scmp.lt.s32.totalorder %s1560_s24, %s1395_s12 }
  0x3c   : > { %p1392_p6 = pnand %p1390_p3, %p1378_p10  ;;  %p1398_p1 = scmp.lt.s32.totalorder %s1396_s20, %s1389_s9 }
  0x3e   : > { %p1393_p9 = pneg %p1392_p6  ;;  %p1399_p4 = por %p1398_p1, %p1397_p11 }
  0x40   : > { %p1400_p5 = pnand %p1399_p4, %p1393_p9 }
  0x42   : > { %1403 = shalt.err (!%p1400_p5)
}
  0x43   : > { %1266 = dma.hbm_to_vmem [thread:$0]  (!%p1556_p7), %s1554_s22, 4096, %s1560_s24, %s1562_s28, %s1446_s26, %s1446_s26, %s1447_s27  }
  0x44   : > { %p1834_p10 = scmp.ne.s32.totalorder %s1831_s19, 0 }
  0x45   : > { %s179_s21 = sand.u32 (!%p1834_p10), 1, %s1434_s13   ;;  %p1835_p1 = scmp.ne.s32.totalorder (!%p1834_p10), %s1830_s18, 0 }
  0x46   : > { %177 = sbr.rel (%p1834_p10) target bundleno = 499 (0x1f3), region = 32  ;;  %s1074_s23 = sshll.u32 (!%p1834_p10), %s179_s21, 8 }
  0x47   : > { %s180_s29 = scalar_lea.sflag (!%p1834_p10), [#allocation3], %s179_s21  ;;  %s1589_s30 = scalar_lea.vmem (!%p1834_p10), [#allocation2], %s1074_s23 }
  0x4b   : > { %1421 = dma.done.wait (%p1835_p1), %s180_s29, 4096  }
  0x4c   : > { %1423 = vsyncadd (%p1835_p1), %s180_s29, 4294963200  ;;  %p1836_p4 = scmp.ne.s32.totalorder %s1829_s17, 0 }
  0x4e   : > { %1425 = dma.done.wait (%p1836_p4), [#allocation5], 1088  }
  0x4f   : > { %1427 = vsyncadd (%p1836_p4), [#allocation5], 4294966208  ;;  %v242_v0 = vld [vmem:[#allocation4 + $0x18] sm:$0xff]  ;;  %v230_v1 = vld [vmem:[#allocation4 + $0x8] sm:$0xff]  ;;  %vm243_vm0 = vcmask 130048   ;;  %vm813_vm1 = vcmask 261120  }
  0x50   : > { %v241_v2 = vld [vmem:[#allocation4 + $0x10] sm:$0xff]  ;;  %1182 = vmatprep.subr.mxu0 %v242_v0  ;;  %1198 = vmatprep.subr.mxu1 %v230_v1  ;;  %v229_v3 = vld [vmem:[#allocation4] sm:$0xff]  ;;  %v1079_v4 = vld [vmem:[%s1589_s30 + $0x8] sm:$0xff]  ;;  %s1077_s17 = sshll.u32 %s1063_s16, 3 }
  0x51   : > { %1183 = vmatpush3.msra.mxu0 %v242_v0  ;;  %1199 = vmatpush3.msra.mxu1 %v230_v1  ;;  %v221_v5 = vld [vmem:[%s1589_s30] sm:$0xff]  ;;  %v1080_v6 = vld [vmem:[%s1589_s30 + $0x28] sm:$0xff]  ;;  %v662_v9 = vld [vmem:[#allocation4 + $0x38] sm:$0xff]  ;;  %p216_p5 = scmp.lt.s32.totalorder %s1077_s17, 15 }
  0x52   : > { %1184 = vmatprep.subr.mxu0 %v241_v2  ;;  %1200 = vmatprep.subr.mxu1 %v229_v3  ;;  %v222_v7 = vld [vmem:[%s1589_s30 + $0x20] sm:$0xff]  ;;  %v513_v8 = vld [vmem:[#allocation4 + $0x28] sm:$0xff]  ;;  %v661_v17 = vld [vmem:[#allocation4 + $0x30] sm:$0xff] }
  0x53   : > { %1185 = vmatpush3.msra.mxu0 %v241_v2  ;;  %1186 = vmatprep.mubr.msk.f32.mxu0 %vm243_vm0, %v1079_v4  ;;  %v1081_v10 = vld [vmem:[%s1589_s30 + $0x48] sm:$0xff]  ;;  %v223_v11 = vld [vmem:[%s1589_s30 + $0x40] sm:$0xff]  ;;  %v1103_v24 = vld [vmem:[%s1589_s30 + $0x10] sm:$0xff]  ;;  %s1842_s17 = smov (!%p216_p5, %s1077_s17), 15 }
  0x54   : > { %1201 = vmatpush3.msra.mxu1 %v229_v3  ;;  %1202 = vmatprep.mubr.msk.f32.mxu1 %vm243_vm0, %v221_v5  ;;  %v1082_v12 = vld [vmem:[%s1589_s30 + $0x68] sm:$0xff]  ;;  %v224_v13 = vld [vmem:[%s1589_s30 + $0x60] sm:$0xff]  ;;  %v1119_v25 = vld [vmem:[%s1589_s30 + $0x18] sm:$0xff]  ;;  %s1078_s15 = sshll.u32 %s1842_s17, 3 }
  0x55   : > { %1187 = vmatmul.mubr.msk.f32.vlgmr.msra.gmra.mxu0 %vm243_vm0, %v1080_v6  ;;  %1203 = vmatmul.mubr.msk.f32.vlgmr.msra.gmra.mxu1 %vm243_vm0, %v222_v7  ;;  %v1083_v14 = vld [vmem:[%s1589_s30 + $0x88] sm:$0xff]  ;;  %v225_v15 = vld [vmem:[%s1589_s30 + $0x80] sm:$0xff]  ;;  %v1104_v26 = vld [vmem:[%s1589_s30 + $0x30] sm:$0xff]  ;;  %s1763_s19 = scalar_lea.vmem %s1824_s3, %s1078_s15 }
  0x56   : > { %1214 = vmatprep.subr.mxu0 %v513_v8  ;;  %1230 = vmatprep.subr.mxu1 %v662_v9  ;;  %v512_v16 = vld [vmem:[#allocation4 + $0x20] sm:$0xff]  ;;  %v1084_v18 = vld [vmem:[%s1589_s30 + $0xa8] sm:$0xff]  ;;  %v1120_v27 = vld [vmem:[%s1589_s30 + $0x38] sm:$0xff] }
  0x57   : > { %1215 = vmatpush3.msra.mxu0 %v513_v8  ;;  %1189 = vmatprep.mubr.msk.f32.mxu0 %vm243_vm0, %v1081_v10  ;;  %v226_v19 = vld [vmem:[%s1589_s30 + $0xa0] sm:$0xff]  ;;  %v1085_v20 = vld [vmem:[%s1589_s30 + $0xc8] sm:$0xff]  ;;  %v1105_v28 = vld [vmem:[%s1589_s30 + $0x50] sm:$0xff] }
  0x58   : > { %1205 = vmatprep.mubr.msk.f32.mxu1 %vm243_vm0, %v223_v11  ;;  %1231 = vmatpush3.msra.mxu1 %v662_v9  ;;  %v227_v21 = vld [vmem:[%s1589_s30 + $0xc0] sm:$0xff]  ;;  %v1086_v22 = vld [vmem:[%s1589_s30 + $0xe8] sm:$0xff]  ;;  %v1121_v29 = vld [vmem:[%s1589_s30 + $0x58] sm:$0xff] }
  0x59   : > { %1190 = vmatmul.mubr.msk.f32.gmra.mxu0 %vm243_vm0, %v1082_v12  ;;  %1206 = vmatmul.mubr.msk.f32.gmra.mxu1 %vm243_vm0, %v224_v13  ;;  %v228_v23 = vld [vmem:[%s1589_s30 + $0xe0] sm:$0xff]  ;;  %v1106_v30 = vld [vmem:[%s1589_s30 + $0x70] sm:$0xff]  ;;  %v1122_v31 = vld [vmem:[%s1589_s30 + $0x78] sm:$0xff] }
  0x5a   : > { %1192 = vmatprep.mubr.msk.f32.mxu0 %vm243_vm0, %v1083_v14  ;;  %1208 = vmatprep.mubr.msk.f32.mxu1 %vm243_vm0, %v225_v15  ;;  %v1107_v32 = vld [vmem:[%s1589_s30 + $0x90] sm:$0xff]  ;;  %v1123_v33 = vld [vmem:[%s1589_s30 + $0x98] sm:$0xff]  ;;  %v1665_v61 = vld [vmem:[#allocation6] ss:$0 sm:$0xff] }
  0x5b   : > { %1216 = vmatprep.subr.mxu0 %v512_v16  ;;  %1232 = vmatprep.subr.mxu1 %v661_v17  ;;  %v1108_v34 = vld [vmem:[%s1589_s30 + $0xb0] sm:$0xff]  ;;  %v1124_v35 = vld [vmem:[%s1589_s30 + $0xb8] sm:$0xff] }
  0x5c   : > { %1217 = vmatpush3.msra.mxu0 %v512_v16  ;;  %1233 = vmatpush3.msra.mxu1 %v661_v17  ;;  %v1109_v36 = vld [vmem:[%s1589_s30 + $0xd0] sm:$0xff]  ;;  %v1125_v37 = vld [vmem:[%s1589_s30 + $0xd8] sm:$0xff] }
  0x5d   : > { %1193 = vmatmul.mubr.msk.f32.gmra.mxu0 %vm243_vm0, %v1084_v18  ;;  %1209 = vmatmul.mubr.msk.f32.gmra.mxu1 %vm243_vm0, %v226_v19  ;;  %v1110_v38 = vld [vmem:[%s1589_s30 + $0xf0] sm:$0xff]  ;;  %v1126_v39 = vld [vmem:[%s1589_s30 + $0xf8] sm:$0xff] }
  0x5e   : > { %1195 = vmatprep.mubr.msk.f32.mxu0 %vm243_vm0, %v1085_v20  ;;  %1211 = vmatprep.mubr.msk.f32.mxu1 %vm243_vm0, %v227_v21 }
  0x61   : > { %1196 = vmatmul.mubr.msk.f32.gmra.mxu0 %vm243_vm0, %v1086_v22  ;;  %1212 = vmatmul.mubr.msk.f32.gmra.mxu1 %vm243_vm0, %v228_v23 }
  0x62   : > { %1218 = vmatprep.mubr.msk.f32.mxu0 %vm243_vm0, %v1103_v24  ;;  %1234 = vmatprep.mubr.msk.f32.mxu1 %vm243_vm0, %v1119_v25 }
  0x65   : > { %1219 = vmatmul.mubr.msk.f32.vlgmr.msra.gmra.mxu0 %vm243_vm0, %v1104_v26  ;;  %1235 = vmatmul.mubr.msk.f32.vlgmr.msra.gmra.mxu1 %vm243_vm0, %v1120_v27 }
  0x66   : > { %1221 = vmatprep.mubr.msk.f32.mxu0 %vm243_vm0, %v1105_v28  ;;  %1237 = vmatprep.mubr.msk.f32.mxu1 %vm243_vm0, %v1121_v29 }
  0x69   : > { %1222 = vmatmul.mubr.msk.f32.gmra.mxu0 %vm243_vm0, %v1106_v30  ;;  %1238 = vmatmul.mubr.msk.f32.gmra.mxu1 %vm243_vm0, %v1122_v31 }
  0x6a   : > { %1224 = vmatprep.mubr.msk.f32.mxu0 %vm243_vm0, %v1107_v32  ;;  %1240 = vmatprep.mubr.msk.f32.mxu1 %vm243_vm0, %v1123_v33 }
  0x6d   : > { %1225 = vmatmul.mubr.msk.f32.gmra.mxu0 %vm243_vm0, %v1108_v34  ;;  %1241 = vmatmul.mubr.msk.f32.gmra.mxu1 %vm243_vm0, %v1124_v35 }
  0x6e   : > { %1227 = vmatprep.mubr.msk.f32.mxu0 %vm243_vm0, %v1109_v36  ;;  %1243 = vmatprep.mubr.msk.f32.mxu1 %vm243_vm0, %v1125_v37 }
  0x71   : > { %1228 = vmatmul.mubr.msk.f32.gmra.mxu0 %vm243_vm0, %v1110_v38  ;;  %1244 = vmatmul.mubr.msk.f32.gmra.mxu1 %vm243_vm0, %v1126_v39 }
 0x115   : > { %v1188_v40 = vpop.f32.mrf.mxu0  ;;  %v1204_v41 = vpop.f32.mrf.mxu1 }
 0x116   : > { %v469_v56 = vadd.f32 %v1204_v41, %v1188_v40 }
 0x117   : > { %v334_v42 = vpop.f32.mrf.mxu0  ;;  %v463_v43 = vpop.f32.mrf.mxu1 }
 0x118   : > { %v464_v59 = vadd.f32 %v463_v43, %v334_v42 }
 0x119   : > { %v1191_v44 = vpop.f32.mrf.mxu0  ;;  %v1207_v45 = vpop.f32.mrf.mxu1 }
 0x11a   : > { %v479_v0 = vadd.f32 %v1207_v45, %v1191_v44 }
 0x11b   : > { %v344_v46 = vpop.f32.mrf.mxu0  ;;  %v473_v47 = vpop.f32.mrf.mxu1 }
 0x11c   : > { %v474_v5 = vadd.f32 %v473_v47, %v344_v46 }
 0x11d   : > { %v1194_v48 = vpop.f32.mrf.mxu0  ;;  %v1210_v49 = vpop.f32.mrf.mxu1 }
 0x11e   : > { %v489_v27 = vadd.f32 %v1210_v49, %v1194_v48 }
 0x11f   : > { %v354_v50 = vpop.f32.mrf.mxu0  ;;  %v483_v51 = vpop.f32.mrf.mxu1 }
 0x120   : > { %v484_v18 = vadd.f32 %v483_v51, %v354_v50 }
 0x121   : > { %v1663_v52 = vpop.f32.mrf.mxu0  ;;  %v1213_v53 = vpop.f32.mrf.mxu1 }
 0x122   : > { %v499_v44 = vadd.f32 %v1213_v53, %v1663_v52 }
 0x123   : > { %v364_v54 = vpop.f32.mrf.mxu0  ;;  %v493_v55 = vpop.f32.mrf.mxu1 }
 0x124   : > { %v494_v37 = vadd.f32 %v493_v55, %v364_v54 }
 0x125   : > { %v1220_v57 = vpop.f32.mrf.mxu0  ;;  %v1236_v58 = vpop.f32.mrf.mxu1 }
 0x126   : > { %v644_v60 = vadd.f32 %v1220_v57, %v469_v56 }
 0x127   : > { %v604_v62 = vpop.f32.mrf.mxu0  ;;  %v753_v63 = vpop.f32.mrf.mxu1 }
 0x128   : > { %v793_v1 = vadd.f32 %v1236_v58, %v644_v60  ;;  %v643_v2 = vadd.f32 %v604_v62, %v464_v59 }
 0x129   : > { %v1223_v3 = vpop.f32.mrf.mxu0  ;;  %v1239_v4 = vpop.f32.mrf.mxu1 }
 0x12a   : > { %v1668_v6 = vadd.f32 %v1665_v61, %v793_v1  ;;  %v792_v7 = vadd.f32 %v753_v63, %v643_v2  ;;  %v646_v8 = vadd.f32 %v1223_v3, %v479_v0 }
 0x12b   : > { %v614_v9 = vpop.f32.mrf.mxu0  ;;  %v763_v10 = vpop.f32.mrf.mxu1 }
 0x12c   : > { %v1671_v11 = vadd.f32 %v1665_v61, %v792_v7  ;;  %v645_v12 = vadd.f32 %v614_v9, %v474_v5  ;;  %v795_v13 = vadd.f32 %v1239_v4, %v646_v8  ;;  %v817_v14 = vsel %vm813_vm1, %v1668_v6, 0.0 }
 0x12d   : > { %v1226_v15 = vpop.f32.mrf.mxu0  ;;  %818 = vadd.xlane.f32.xlu0 %v817_v14  ;;  %v848_v16 = vmul.f32 %v1668_v6, %v1668_v6  ;;  %v1242_v17 = vpop.f32.mrf.mxu1 }
 0x12e   : > { %v794_v19 = vadd.f32 %v763_v10, %v645_v12  ;;  %v1678_v20 = vadd.f32 %v1665_v61, %v795_v13  ;;  %v814_v25 = vsel %vm813_vm1, %v1671_v11, 0.0  ;;  %v847_v26 = vmul.f32 %v1671_v11, %v1671_v11 }
 0x12f   : > { %v624_v21 = vpop.f32.mrf.mxu0  ;;  %v858_v22 = vsel %vm813_vm1, %v848_v16, 0.0  ;;  %v773_v29 = vpop.f32.mrf.mxu1  ;;  %v648_v30 = vadd.f32 %v1226_v15, %v489_v27 }
 0x130   : > { %v1682_v23 = vadd.f32 %v1665_v61, %v794_v19  ;;  %v647_v24 = vadd.f32 %v624_v21, %v484_v18  ;;  %859 = vadd.xlane.f32.xlu1 %v858_v22  ;;  %v823_v31 = vsel %vm813_vm1, %v1678_v20, 0.0  ;;  %v855_v33 = vsel %vm813_vm1, %v847_v26, 0.0 }
 0x131   : > { %v1229_v28 = vpop.f32.mrf.mxu0  ;;  %815 = vadd.xlane.f32.xlu0 %v814_v25  ;;  %v1245_v36 = vpop.f32.mrf.mxu1  ;;  %v797_v38 = vadd.f32 %v1242_v17, %v648_v30  ;;  %v850_v40 = vmul.f32 %v1678_v20, %v1678_v20 }
 0x132   : > { %v796_v32 = vadd.f32 %v773_v29, %v647_v24  ;;  %v849_v34 = vmul.f32 %v1682_v23, %v1682_v23  ;;  %v820_v39 = vsel %vm813_vm1, %v1682_v23, 0.0  ;;  %v650_v47 = vadd.f32 %v1229_v28, %v499_v44 }
 0x133   : > { %v634_v35 = vpop.f32.mrf.mxu0  ;;  %v783_v45 = vpop.f32.mrf.mxu1  ;;  %v1703_v46 = vadd.f32 %v1665_v61, %v797_v38  ;;  %v864_v48 = vsel %vm813_vm1, %v850_v40, 0.0 }
 0x134   : > { %824 = vadd.xlane.f32.xlu1 %v823_v31  ;;  %v1698_v41 = vadd.f32 %v1665_v61, %v796_v32  ;;  %v649_v42 = vadd.f32 %v634_v35, %v494_v37  ;;  %v861_v43 = vsel %vm813_vm1, %v849_v34, 0.0  ;;  %v799_v54 = vadd.f32 %v1245_v36, %v650_v47 }
 0x135   : > { %856 = vadd.xlane.f32.xlu0 %v855_v33  ;;  %v829_v52 = vsel %vm813_vm1, %v1703_v46, 0.0  ;;  %v852_v53 = vmul.f32 %v1703_v46, %v1703_v46 }
 0x136   : > { %v798_v49 = vadd.f32 %v783_v45, %v649_v42  ;;  %v826_v50 = vsel %vm813_vm1, %v1698_v41, 0.0  ;;  %v851_v51 = vmul.f32 %v1698_v41, %v1698_v41  ;;  %v1719_v57 = vadd.f32 %v1665_v61, %v799_v54 }
 0x137   : > { %v870_v58 = vsel %vm813_vm1, %v852_v53, 0.0 }
 0x138   : > { %821 = vadd.xlane.f32.xlu1 %v820_v39  ;;  %v1715_v55 = vadd.f32 %v1665_v61, %v798_v49  ;;  %v867_v56 = vsel %vm813_vm1, %v851_v51, 0.0  ;;  %v835_v62 = vsel %vm813_vm1, %v1719_v57, 0.0  ;;  %v854_v63 = vmul.f32 %v1719_v57, %v1719_v57 }
 0x139   : > { %862 = vadd.xlane.f32.xlu0 %v861_v43 }
 0x13a   : > { %v832_v59 = vsel %vm813_vm1, %v1715_v55, 0.0  ;;  %v853_v60 = vmul.f32 %v1715_v55, %v1715_v55  ;;  %v876_v0 = vsel %vm813_vm1, %v854_v63, 0.0 }
 0x13c   : > { %865 = vadd.xlane.f32.xlu1 %v864_v48  ;;  %v873_v61 = vsel %vm813_vm1, %v853_v60, 0.0  ;;  %v1757_v60 = vld [vmem:[#allocation6 + $0x2] ss:$0 sm:$0xff] }
 0x13d   : > { %827 = vadd.xlane.f32.xlu0 %v826_v50 }
 0x140   : > { %830 = vadd.xlane.f32.xlu1 %v829_v52  ;;  %v1755_v52 = vld [vmem:[#allocation6 + $0x1] ss:$0 sm:$0xff] }
 0x141   : > { %868 = vadd.xlane.f32.xlu0 %v867_v56 }
 0x144   : > { %871 = vadd.xlane.f32.xlu1 %v870_v58 }
 0x145   : > { %833 = vadd.xlane.f32.xlu0 %v832_v59 }
 0x148   : > { %836 = vadd.xlane.f32.xlu1 %v835_v62 }
 0x149   : > { %874 = vadd.xlane.f32.xlu0 %v873_v61 }
 0x14c   : > { %877 = vadd.xlane.f32.xlu1 %v876_v0 }
 0x1b6   : > { %v819_v1 = vpop.xlane.xlu0 %818 }
 0x1b7   : > { %v840_v2 = vmul.f32 0.03125, %v819_v1 }
 0x1b9   : > { %v888_v3 = vmul.f32 %v840_v2, %v840_v2  ;;  %v860_v4 = vpop.xlane.xlu1 %859  ;;  %v928_v48 = vsub.f32 %v1668_v6, %v840_v2 }
 0x1ba   : > { %v880_v5 = vmul.f32 0.03125, %v860_v4  ;;  %v816_v7 = vpop.xlane.xlu0 %815 }
 0x1bb   : > { %v1732_v8 = vmul.f32 0.03125, %v816_v7 }
 0x1bc   : > { %v896_v9 = vsub.f32 %v880_v5, %v888_v3 }
 0x1bd   : > { %v825_v10 = vpop.xlane.xlu1 %824  ;;  %v887_v14 = vmul.f32 %v1732_v8, %v1732_v8  ;;  %v927_v2 = vsub.f32 %v1671_v11, %v1732_v8 }
 0x1be   : > { %v904_v12 = vmax.f32 %v896_v9, 0.0  ;;  %v857_v13 = vpop.xlane.xlu0 %856  ;;  %v1736_v19 = vmul.f32 0.03125, %v825_v10 }
 0x1bf   : > { %v879_v15 = vmul.f32 0.03125, %v857_v13 }
 0x1c0   : > { %v912_v16 = vadd.f32 1e-05, %v904_v12  ;;  %v890_v29 = vmul.f32 %v1736_v19, %v1736_v19 }
 0x1c1   : > { %v895_v17 = vsub.f32 %v879_v15, %v887_v14  ;;  %v822_v18 = vpop.xlane.xlu1 %821 }
 0x1c2   : > { %1308 = vrsqrt.f32 %v912_v16  ;;  %v1738_v21 = vmul.f32 0.03125, %v822_v18  ;;  %v863_v22 = vpop.xlane.xlu0 %862 }
 0x1c3   : > { %v903_v24 = vmax.f32 %v895_v17, 0.0  ;;  %v881_v25 = vmul.f32 0.03125, %v863_v22 }
 0x1c4   : > { %v889_v26 = vmul.f32 %v1738_v21, %v1738_v21  ;;  %v929_v11 = vsub.f32 %v1682_v23, %v1738_v21 }
 0x1c5   : > { %v911_v27 = vadd.f32 1e-05, %v903_v24  ;;  %v866_v28 = vpop.xlane.xlu1 %865 }
 0x1c6   : > { %v897_v30 = vsub.f32 %v881_v25, %v889_v26  ;;  %v882_v31 = vmul.f32 0.03125, %v866_v28  ;;  %v828_v32 = vpop.xlane.xlu0 %827  ;;  %v930_v25 = vsub.f32 %v1678_v20, %v1736_v19 }
 0x1c7   : > { %1310 = vrsqrt.f32 %v911_v27  ;;  %v1746_v33 = vmul.f32 0.03125, %v828_v32 }
 0x1c8   : > { %v905_v34 = vmax.f32 %v897_v30, 0.0  ;;  %v898_v35 = vsub.f32 %v882_v31, %v890_v29 }
 0x1c9   : > { %v831_v36 = vpop.xlane.xlu1 %830  ;;  %v891_v42 = vmul.f32 %v1746_v33, %v1746_v33  ;;  %v931_v20 = vsub.f32 %v1698_v41, %v1746_v33 }
 0x1ca   : > { %v913_v37 = vadd.f32 1e-05, %v905_v34  ;;  %v906_v38 = vmax.f32 %v898_v35, 0.0  ;;  %v1748_v39 = vmul.f32 0.03125, %v831_v36  ;;  %v869_v40 = vpop.xlane.xlu0 %868 }
 0x1cb   : > { %v883_v43 = vmul.f32 0.03125, %v869_v40 }
 0x1cc   : > { %1312 = vrsqrt.f32 %v913_v37  ;;  %v914_v44 = vadd.f32 1e-05, %v906_v38  ;;  %v892_v49 = vmul.f32 %v1748_v39, %v1748_v39  ;;  %v932_v35 = vsub.f32 %v1703_v46, %v1748_v39 }
 0x1cd   : > { %v899_v45 = vsub.f32 %v883_v43, %v891_v42  ;;  %v872_v47 = vpop.xlane.xlu1 %871 }
 0x1ce   : > { %1314 = vrsqrt.f32 %v914_v44  ;;  %v884_v50 = vmul.f32 0.03125, %v872_v47  ;;  %v834_v51 = vpop.xlane.xlu0 %833 }
 0x1cf   : > { %v1309_v54 = vpop.eup %1308  ;;  %v907_v53 = vmax.f32 %v899_v45, 0.0  ;;  %v845_v56 = vmul.f32 0.03125, %v834_v51 }
 0x1d0   : > { %v936_v58 = vmul.f32 %v1309_v54, %v928_v48  ;;  %v900_v59 = vsub.f32 %v884_v50, %v892_v49 }
 0x1d1   : > { %v915_v62 = vadd.f32 1e-05, %v907_v53  ;;  %v837_v63 = vpop.xlane.xlu1 %836  ;;  %v893_v3 = vmul.f32 %v845_v56, %v845_v56  ;;  %v933_v33 = vsub.f32 %v1715_v55, %v845_v56 }
 0x1d2   : > { %v949_v6 = vmul.f32 %v1755_v52, %v936_v58  ;;  %v908_v61 = vmax.f32 %v900_v59, 0.0  ;;  %v846_v0 = vmul.f32 0.03125, %v837_v63  ;;  %v875_v1 = vpop.xlane.xlu0 %874 }
 0x1d3   : > { %1316 = vrsqrt.f32 %v915_v62  ;;  %v885_v4 = vmul.f32 0.03125, %v875_v1 }
 0x1d4   : > { %v1311_v5 = vpop.eup %1310  ;;  %v962_v7 = vadd.f32 %v1757_v60, %v949_v6  ;;  %v916_v9 = vadd.f32 1e-05, %v908_v61  ;;  %v894_v14 = vmul.f32 %v846_v0, %v846_v0  ;;  %v934_v46 = vsub.f32 %v1719_v57, %v846_v0 }
 0x1d5   : > { %v935_v10 = vmul.f32 %v1311_v5, %v927_v2  ;;  %v901_v12 = vsub.f32 %v885_v4, %v893_v3  ;;  %v878_v13 = vpop.xlane.xlu1 %877 }
 0x1d6   : > { %970 = vst.msk [vmem:[%s1763_s19 + $0x8] sm:$0xff] %vm813_vm1, %v962_v7  ;;  %1318 = vrsqrt.f32 %v916_v9  ;;  %v886_v15 = vmul.f32 0.03125, %v878_v13 }
 0x1d7   : > { %v948_v16 = vmul.f32 %v1755_v52, %v935_v10  ;;  %v909_v17 = vmax.f32 %v901_v12, 0.0 }
 0x1d8   : > { %v902_v8 = vsub.f32 %v886_v15, %v894_v14 }
 0x1d9   : > { %v1313_v18 = vpop.eup %1312  ;;  %v961_v22 = vadd.f32 %v1757_v60, %v948_v16  ;;  %v917_v24 = vadd.f32 1e-05, %v909_v17 }
 0x1da   : > { %v937_v26 = vmul.f32 %v1313_v18, %v929_v11  ;;  %v910_v27 = vmax.f32 %v902_v8, 0.0 }
 0x1db   : > { %v1315_v28 = vpop.eup %1314  ;;  %969 = vst.msk [vmem:[%s1763_s19] sm:$0xff] %vm813_vm1, %v961_v22  ;;  %1320 = vrsqrt.f32 %v917_v24 }
 0x1dc   : > { %v950_v29 = vmul.f32 %v1755_v52, %v937_v26  ;;  %v938_v30 = vmul.f32 %v1315_v28, %v930_v25  ;;  %v918_v23 = vadd.f32 1e-05, %v910_v27 }
 0x1de   : > { %v963_v21 = vadd.f32 %v1757_v60, %v950_v29  ;;  %v951_v31 = vmul.f32 %v1755_v52, %v938_v30  ;;  %1322 = vrsqrt.f32 %v918_v23 }
 0x1e0   : > { %v1317_v19 = vpop.eup %1316  ;;  %971 = vst.msk [vmem:[%s1763_s19 + $0x10] sm:$0xff] %vm813_vm1, %v963_v21  ;;  %v964_v32 = vadd.f32 %v1757_v60, %v951_v31 }
 0x1e1   : > { %v939_v34 = vmul.f32 %v1317_v19, %v931_v20 }
 0x1e2   : > { %972 = vst.msk [vmem:[%s1763_s19 + $0x18] sm:$0xff] %vm813_vm1, %v964_v32 }
 0x1e3   : > { %v1319_v36 = vpop.eup %1318  ;;  %v952_v37 = vmul.f32 %v1755_v52, %v939_v34 }
 0x1e4   : > { %v940_v38 = vmul.f32 %v1319_v36, %v932_v35 }
 0x1e5   : > { %v965_v40 = vadd.f32 %v1757_v60, %v952_v37 }
 0x1e6   : > { %v953_v41 = vmul.f32 %v1755_v52, %v940_v38 }
 0x1e7   : > { %973 = vst.msk [vmem:[%s1763_s19 + $0x20] sm:$0xff] %vm813_vm1, %v965_v40 }
 0x1e8   : > { %v1321_v42 = vpop.eup %1320  ;;  %v966_v43 = vadd.f32 %v1757_v60, %v953_v41 }
 0x1e9   : > { %v941_v44 = vmul.f32 %v1321_v42, %v933_v33 }
 0x1ea   : > { %974 = vst.msk [vmem:[%s1763_s19 + $0x28] sm:$0xff] %vm813_vm1, %v966_v43 }
 0x1eb   : > { %v1323_v39 = vpop.eup %1322  ;;  %v954_v45 = vmul.f32 %v1755_v52, %v941_v44 }
 0x1ec   : > { %v942_v47 = vmul.f32 %v1323_v39, %v934_v46 }
 0x1ed   : > { %v967_v48 = vadd.f32 %v1757_v60, %v954_v45 }
 0x1ee   : > { %v955_v49 = vmul.f32 %v1755_v52, %v942_v47 }
 0x1ef   : > { %975 = vst.msk [vmem:[%s1763_s19 + $0x30] sm:$0xff] %vm813_vm1, %v967_v48 }
 0x1f0   : > { %v968_v55 = vadd.f32 %v1757_v60, %v955_v49 }
 0x1f2   : > { %976 = vst.msk [vmem:[%s1763_s19 + $0x38] sm:$0xff] %vm813_vm1, %v968_v55 }
 0x1f3 PF: > { %p14_p7 = scmp.ge.s32.totalorder %s1537_s6, 4   ;;  %s1837_s12 = smov %s1434_s13 }
 0x1f4   : > { %s1838_s13 = smov %s1438_s14  ;;  %s1839_s14 = smov %s1548_s10 }
 0x1f5   : > { %s1840_s15 = smov %s1537_s6  ;;  %16 = sbr.rel (!%p14_p7) target bundleno = 4 (0x4), region = 86 }
 0x1fa   :  { %999 = vsyncpa [#allocation3], 1 }
 0x1fb   :  { %1001 = vsyncpa [#allocation3 + $0x1], 1 }
 0x1fc   :  { %1002 = vsyncpa [#allocation5], 1 }

</bundles_post_ra>
